<compile_context>
chip_gen: v7x
topology: tpu7x:2x2x1
jax: 0.10.0
libtpu: 0.0.40
codegen_flags: <defaults>
</compile_context>

<pallas_src>
import functools

import jax
import jax.numpy as jnp
import numpy as np
from jax.experimental import pallas as pl
from jax.experimental.pallas import tpu as pltpu


def _my_bn_kernel(x_ref, o_ref, *, inv_hw):
    x = x_ref[...].astype(jnp.float32)                 # (rb, H*W), f32 accumulation
    m = jnp.sum(x, axis=1, keepdims=True) * inv_hw     # (rb, 1) per-(n,c) spatial mean
    o_ref[...] = (x - m).astype(o_ref.dtype)


def my_bn(x, rows_per_block=None):
    """x: (N, C, H, W) -> x - mean(x, axis=(2, 3), keepdims=True) (My_Bn.forward)."""
    n, c, h, w = x.shape
    nc, hw = n * c, h * w
    itemsize = jnp.dtype(x.dtype).itemsize
    sub = {4: 8, 2: 16, 1: 32}.get(itemsize, 8)        # sublane packing for the dtype

    if rows_per_block is None:
        # 2 (double-buffer) x (in + out) blocks live in VMEM; stay well under the
        # default scoped-VMEM limit on v5e/v6e/v7x while amortizing grid-step cost.
        vmem_budget = 16 * 1024 * 1024
        bytes_per_row = max(1, hw * itemsize * 2 * 2)
        budget_rows = (vmem_budget // bytes_per_row) // sub * sub
        rows_per_block = max(sub, min(1024, budget_rows))
    rb = max(sub, (rows_per_block // sub) * sub)
    nc_aligned = ((nc + sub - 1) // sub) * sub
    rb = min(rb, nc_aligned)                           # don't over-allocate tiny inputs

    xf = x.reshape(nc, hw)                             # contiguous -> free reshape

    out = pl.pallas_call(
        functools.partial(_my_bn_kernel, inv_hw=1.0 / float(hw)),
        out_shape=jax.ShapeDtypeStruct((nc, hw), x.dtype),
        grid_spec=pltpu.PrefetchScalarGridSpec(
            num_scalar_prefetch=0,
            grid=(pl.cdiv(nc, rb),),                   # edge block masked by Pallas
            in_specs=[pl.BlockSpec((rb, hw), lambda i: (i, 0))],
            out_specs=pl.BlockSpec((rb, hw), lambda i: (i, 0)),
        ),
        compiler_params=pltpu.CompilerParams(
            dimension_semantics=("parallel",)),
    )(xf)

    return out.reshape(n, c, h, w)


def reference(x):
    """Pure-JAX reference of My_Bn.forward."""
    return x - jnp.mean(x, axis=(2, 3), keepdims=True)


if __name__ == "__main__":
    key = jax.random.PRNGKey(0)
    x = jax.random.normal(key, (2, 4, 16, 16), dtype=jnp.float32)

    out = my_bn(x)
    out = jax.block_until_ready(out)

    ref = reference(x)
    np.testing.assert_allclose(np.asarray(out), np.asarray(ref), rtol=1e-6, atol=1e-6)
    assert out.shape == (2, 4, 16, 16)
    print("KERNEL_OK")
</pallas_src>

<mosaic_0001>
module attributes {stable_mosaic.version = 11 : i64} {
  func.func @_my_bn_kernel(%arg0: i32, %arg1: memref<8x256xf32, #tpu.memory_space<vmem>>, %arg2: memref<8x256xf32, #tpu.memory_space<vmem>>) attributes {dimension_semantics = [#tpu.dimension_semantics<parallel>], iteration_bounds = array<i64: 1>, scalar_prefetch = 0 : i64, scratch_operands = 0 : i64, tpu.core_type = #tpu.core_type<tc>, window_params = [{transform_indices = @transform_0, window_bounds = array<i64: 8, 256>}, {transform_indices = @transform_1, window_bounds = array<i64: 8, 256>}]} {
    %c0 = arith.constant 0 : index
    %c0_0 = arith.constant 0 : index
    %0 = vector.load %arg1[%c0, %c0_0] : memref<8x256xf32, #tpu.memory_space<vmem>>, vector<8x256xf32>
    %cst = arith.constant dense<0.000000e+00> : vector<8xf32>
    %1 = vector.multi_reduction <add>, %0, %cst [1] : vector<8x256xf32> to vector<8xf32>
    %2 = vector.shape_cast %1 : vector<8xf32> to vector<8x1xf32>
    %cst_1 = arith.constant 3.906250e-03 : f32
    %3 = vector.broadcast %cst_1 : f32 to vector<8x1xf32>
    %4 = arith.mulf %2, %3 : vector<8x1xf32>
    %5 = vector.broadcast %4 : vector<8x1xf32> to vector<8x256xf32>
    %6 = arith.subf %0, %5 : vector<8x256xf32>
    %c0_2 = arith.constant 0 : index
    %c0_3 = arith.constant 0 : index
    %7 = vector.load %arg2[%c0_2, %c0_3] : memref<8x256xf32, #tpu.memory_space<vmem>>, vector<8x256xf32>
    tpu.vector_store %arg2[%c0_2, %c0_3], %6 {strides = array<i32>} : memref<8x256xf32, #tpu.memory_space<vmem>>, vector<8x256xf32>,
    return
  }
  func.func @transform_0(%arg0: i32) -> (i32, i32) {
    %c0_i32 = arith.constant 0 : i32
    %c0_i32_0 = arith.constant 0 : i32
    return %arg0, %c0_i32 : i32, i32
  }
  func.func @transform_1(%arg0: i32) -> (i32, i32) {
    %c0_i32 = arith.constant 0 : i32
    %c0_i32_0 = arith.constant 0 : i32
    return %arg0, %c0_i32 : i32, i32
  }
}

</mosaic_0001>

<bundles_post_ra>
// kernel: tpu_custom_call.1
= control target key start
LH: loop header
LB: loop body
LE: loop exit
PB: predicated region body
PF: predicated region fallthrough
CT: control target
= control target key end

     0   :  { %6 = vsyncpa [#allocation3], 0  ;;  %s132_s0 = inlined_call_operand.hbm [shape: f32[8,256], index: 0, kind: input, shape index: {}]   ;;  %s133_s1 = inlined_call_operand.hbm [shape: f32[8,256], index: 1, kind: output, shape index: {}]  }
   0x1   :  { %7 = vsyncpa [#allocation4], 0  ;;  %s96_s6 = smov [#allocation2]   ;;  %s48_s10 = scalar_lea.hbm %s132_s0, 256 }
   0x2   :  { %s14_s7 = sshll.u32 %s96_s6, 4  ;;  %p49_p0 = scmp.ne.s32.totalorder %s132_s0, %s48_s10  ;;  %s15_s7 = int_to_ptr.vmem [resolvable:$true] %s14_s7 }
   0x3   :  { %p52_p1 = scmp.lt.u32.totalorder %s48_s10, %s132_s0 }
   0x5   :  { %p54_p2 = pnand %p52_p1, %p49_p0 }
   0x7   :  { %57 = shalt.err (!%p54_p2)
}
   0x8   :  { %s58_s15 = scalar_lea.vmem %s15_s7, 256  ;;  %p63_p4 = scmp.lt.s32.totalorder %s15_s7, %s15_s7 }
   0x9   :  { %p59_p3 = scmp.ne.s32.totalorder %s15_s7, %s58_s15  ;;  %p64_p5 = scmp.lt.s32.totalorder %s58_s15, %s58_s15 }
   0xb   :  { %p65_p6 = por %p64_p5, %p63_p4 }
   0xd   :  { %p66_p7 = pnand %p65_p6, %p59_p3 }
   0xf   :  { %69 = shalt.err (!%p66_p7)
}
  0x10   :  { %17 = dma.hbm_to_vmem [thread:$0]  %s132_s0, 256, %s15_s7, [#allocation3]  }
  0x11   :  { %92 = dma.done.wait [#allocation3], 256  }
  0x12   :  { %93 = vsyncadd [#allocation3], 4294967040  ;;  %v21_v0 = vld [vmem:[#allocation2] sm:$0xff]  ;;  %v22_v1 = vld [vmem:[#allocation2 + $0x8] sm:$0xff]  ;;  %s97_s18 = smov [#allocation5]  }
  0x13   :  { %v23_v2 = vadd.f32 %v22_v1, %v21_v0  ;;  %s37_s19 = sshll.u32 %s97_s18, 4  ;;  %s38_s19 = int_to_ptr.vmem [resolvable:$true] %s37_s19 }
  0x14   :  { %s70_s20 = scalar_lea.vmem %s38_s19, 256  ;;  %p75_p9 = scmp.lt.s32.totalorder %s38_s19, %s38_s19 }
  0x15   :  { %24 = vadd.xlane.f32.xlu0 %v23_v2  ;;  %p71_p8 = scmp.ne.s32.totalorder %s38_s19, %s70_s20  ;;  %p76_p10 = scmp.lt.s32.totalorder %s70_s20, %s70_s20 }
  0x17   :  { %p77_p11 = por %p76_p10, %p75_p9 }
  0x19   :  { %p78_p12 = pnand %p77_p11, %p71_p8 }
  0xa2   :  { %v25_v3 = vpop.xlane.xlu0 %24 }
  0xa3   :  { %v26_v4 = vmul.f32 0.00390625, %v25_v3 }
  0xa5   :  { %v27_v5 = vsub.f32 %v21_v0, %v26_v4  ;;  %v28_v6 = vsub.f32 %v22_v1, %v26_v4 }
  0xa7   :  { %29 = vst [vmem:[#allocation5] sm:$0xff] %v27_v5  ;;  %30 = vst [vmem:[#allocation5 + $0x8] sm:$0xff] %v28_v6 }
  0xa8   :  { %81 = shalt.err (!%p78_p12)
}
  0xa9   :  { %s82_s22 = scalar_lea.hbm %s133_s1, 256 }
  0xaa   :  { %p83_p13 = scmp.ne.s32.totalorder %s133_s1, %s82_s22  ;;  %p86_p0 = scmp.lt.u32.totalorder %s82_s22, %s133_s1 }
  0xac   :  { %p88_p1 = pnand %p86_p0, %p83_p13 }
  0xae   :  { %91 = shalt.err (!%p88_p1)
}
  0xaf   :  { %40 = dma.vmem_to_hbm [thread:$0]  %s38_s19, 256, %s133_s1, [#allocation4]  }
  0xb0   :  { %94 = dma.done.wait [#allocation4], 256  }
  0xb1   :  { %95 = vsyncadd [#allocation4], 4294967040 }
  0xb2   :  { %44 = vsyncpa [#allocation3], 1 }
  0xb3   :  { %45 = vsyncpa [#allocation4], 1 }

</bundles_post_ra>
